<compile_context>
chip_gen: v5e
topology: v5e:2x2
jax: 0.10.0
libtpu: 0.0.40
codegen_flags: <defaults>
</compile_context>

<pallas_src>
import functools

import jax
import jax.numpy as jnp
from jax.experimental import pallas as pl
from jax.experimental.pallas import tpu as pltpu

# 784 -> 128 -> 64 -> 12 -> 3 -> 12 -> 64 -> 128 -> 784
LAYER_DIMS = [28 * 28, 128, 64, 12, 3, 12, 64, 128, 28 * 28]
LANE = 128
SUBLANE = 8


def _round_up(n, m):
    return (n + m - 1) // m * m


PADDED_DIMS = [_round_up(d, LANE) for d in LAYER_DIMS]  # [896,128,...,128,896]


def autoencoder_kernel(x_ref, *refs):
    """refs = (w1, b1, ..., w8, b8, o_ref).

    x_ref is bf16 (ready as MXU LHS), weights bf16, biases f32.
    Bias-add / ReLU run in f32 on the VPU; f32 activations are re-cast to bf16
    only for the next layer's dot.
    """
    o_ref = refs[-1]
    param_refs = refs[:-1]
    n_layers = len(param_refs) // 2

    h_bf16 = x_ref[...]                      # (TB, 896) bf16, no cast needed
    h_f32 = None
    for i in range(n_layers):
        w = param_refs[2 * i][...]           # (in_pad, out_pad) bf16
        b = param_refs[2 * i + 1][...]       # (1, out_pad)      f32
        acc = jnp.dot(h_bf16, w, preferred_element_type=jnp.float32)  # MXU
        h_f32 = jnp.maximum(acc + b, 0.0)    # bias-add + ReLU in f32
        if i + 1 < n_layers:
            h_bf16 = h_f32.astype(jnp.bfloat16)
    o_ref[...] = h_f32.astype(o_ref.dtype)


def prepare_params(params):
    """Zero-pad every layer to 128-lane multiples and cast weights to bf16.

    Padding is exact: zero weight rows/cols and zero bias lanes produce
    relu(0)=0 activations that contribute nothing downstream.
    """
    padded = []
    for i, (w, b) in enumerate(params):
        in_p, out_p = PADDED_DIMS[i], PADDED_DIMS[i + 1]
        wp = jnp.zeros((in_p, out_p), jnp.float32).at[: w.shape[0], : w.shape[1]].set(w)
        bp = jnp.zeros((1, out_p), jnp.float32).at[:, : b.shape[1]].set(b)
        padded.append((wp.astype(jnp.bfloat16), bp))
    return padded


def _choose_tiling(batch, batch_tile):
    """Pick (tile_rows, padded_batch).

    Small-batch path: if the whole batch fits in one tile, pad only to a
    multiple of 8 rows (sublane constraint) instead of a full tile.  Otherwise
    use `batch_tile` rows per grid step; the grid then has >= 2 steps, so the
    "parallel" batch axis can split across both TensorCores on v7x.
    """
    rows = _round_up(max(batch, 1), SUBLANE)
    if rows <= batch_tile:
        return rows, rows
    tile = _round_up(batch_tile, SUBLANE)
    return tile, _round_up(rows, tile)


@functools.partial(jax.jit, static_argnames=("batch_tile", "out_dtype"))
def autoencoder_forward(x, padded_params, *, batch_tile=512, out_dtype=jnp.float32):
    """x: (B, 784) float32. padded_params: output of prepare_params().

    batch_tile: rows per grid step (512 default; 1024 for max HBM throughput
    on v6e/v7x, keep <=512 on v5e unless vmem_limit_bytes is raised).
    out_dtype: float32 (default, matches PyTorch) or bfloat16 to halve output
    HBM traffic at a small precision cost.
    """
    B = x.shape[0]
    in_pad, out_pad = PADDED_DIMS[0], PADDED_DIMS[-1]
    tile, b_pad = _choose_tiling(B, batch_tile)

    # Pad batch rows and features to 896 lanes; ship the slab as bf16 (the MXU
    # LHS operand is bf16 anyway) to halve input DMA and drop in-kernel casts.
    xp = jnp.zeros((b_pad, in_pad), jnp.bfloat16)
    xp = xp.at[:B, : LAYER_DIMS[0]].set(x.astype(jnp.bfloat16))

    flat = []
    param_specs = []
    for w, b in padded_params:
        flat.extend([w, b])
        # Constant index_map -> weights/biases stay resident in VMEM.
        param_specs.append(pl.BlockSpec(w.shape, lambda i: (0, 0)))
        param_specs.append(pl.BlockSpec(b.shape, lambda i: (0, 0)))

    n_tiles = b_pad // tile

    flops = 2 * b_pad * sum(
        PADDED_DIMS[i] * PADDED_DIMS[i + 1] for i in range(len(PADDED_DIMS) - 1)
    )
    out_itemsize = jnp.dtype(out_dtype).itemsize
    bytes_accessed = (
        b_pad * in_pad * 2                                        # bf16 input
        + b_pad * out_pad * out_itemsize                          # output
        + sum(w.size * 2 + b.size * 4 for w, b in padded_params)  # params
    )

    out = pl.pallas_call(
        autoencoder_kernel,
        out_shape=jax.ShapeDtypeStruct((b_pad, out_pad), out_dtype),
        grid=(n_tiles,),
        in_specs=[pl.BlockSpec((tile, in_pad), lambda i: (i, 0))] + param_specs,
        out_specs=pl.BlockSpec((tile, out_pad), lambda i: (i, 0)),
        compiler_params=pltpu.CompilerParams(
            dimension_semantics=("parallel",),
            vmem_limit_bytes=32 << 20,
        ),
        cost_estimate=pl.CostEstimate(
            flops=flops, transcendentals=0, bytes_accessed=bytes_accessed
        ),
    )(xp, *flat)

    # Slice off batch padding and the 784->896 lane padding.
    return out[:B, : LAYER_DIMS[-1]]


def init_params(key):
    """Deterministic init mimicking PyTorch nn.Linear default:
    U(-1/sqrt(fan_in), 1/sqrt(fan_in)) for weight and bias."""
    params = []
    for i in range(len(LAYER_DIMS) - 1):
        fan_in, fan_out = LAYER_DIMS[i], LAYER_DIMS[i + 1]
        key, kw, kb = jax.random.split(key, 3)
        bound = 1.0 / float(fan_in) ** 0.5
        w = jax.random.uniform(kw, (fan_in, fan_out), jnp.float32, -bound, bound)
        b = jax.random.uniform(kb, (1, fan_out), jnp.float32, -bound, bound)
        params.append((w, b))
    return params


def reference_forward(x, params):
    """Pure-JAX reference using the same bf16-operand / f32-accumulate recipe."""
    h = x.astype(jnp.bfloat16)
    for w, b in params:
        acc = jnp.dot(h, w.astype(jnp.bfloat16),
                      preferred_element_type=jnp.float32)
        hf = jnp.maximum(acc + b, 0.0)
        h = hf.astype(jnp.bfloat16)
    return hf


if __name__ == "__main__":
    key = jax.random.PRNGKey(0)
    key, kx = jax.random.split(key)

    B = 2
    x = jax.random.uniform(kx, (B, 28 * 28), jnp.float32)  # flattened (B,1,28,28)

    params = init_params(key)
    padded_params = prepare_params(params)

    y = autoencoder_forward(x, padded_params)
    y = jax.block_until_ready(y)

    y_ref = reference_forward(x, params)
    assert y.shape == (B, 28 * 28)
    assert jnp.allclose(y, y_ref, atol=1e-2, rtol=1e-2), (
        float(jnp.max(jnp.abs(y - y_ref)))
    )

    print("KERNEL_OK")
</pallas_src>

<mosaic_0001>
module attributes {stable_mosaic.version = 11 : i64} {
  func.func @autoencoder_kernel(%arg0: i32, %arg1: memref<8x896xbf16, #tpu.memory_space<vmem>>, %arg2: memref<896x128xbf16, #tpu.memory_space<vmem>>, %arg3: memref<1x128xf32, #tpu.memory_space<vmem>>, %arg4: memref<128x128xbf16, #tpu.memory_space<vmem>>, %arg5: memref<1x128xf32, #tpu.memory_space<vmem>>, %arg6: memref<128x128xbf16, #tpu.memory_space<vmem>>, %arg7: memref<1x128xf32, #tpu.memory_space<vmem>>, %arg8: memref<128x128xbf16, #tpu.memory_space<vmem>>, %arg9: memref<1x128xf32, #tpu.memory_space<vmem>>, %arg10: memref<128x128xbf16, #tpu.memory_space<vmem>>, %arg11: memref<1x128xf32, #tpu.memory_space<vmem>>, %arg12: memref<128x128xbf16, #tpu.memory_space<vmem>>, %arg13: memref<1x128xf32, #tpu.memory_space<vmem>>, %arg14: memref<128x128xbf16, #tpu.memory_space<vmem>>, %arg15: memref<1x128xf32, #tpu.memory_space<vmem>>, %arg16: memref<128x896xbf16, #tpu.memory_space<vmem>>, %arg17: memref<1x896xf32, #tpu.memory_space<vmem>>, %arg18: memref<8x896xf32, #tpu.memory_space<vmem>>) attributes {dimension_semantics = [#tpu.dimension_semantics<parallel>], iteration_bounds = array<i64: 1>, scalar_prefetch = 0 : i64, scratch_operands = 0 : i64, tpu.core_type = #tpu.core_type<tc>, window_params = [{transform_indices = @transform_0, window_bounds = array<i64: 8, 896>}, {pipeline_mode = #tpu.pipeline_mode<synchronous>, transform_indices = @transform_1, window_bounds = array<i64: 896, 128>}, {pipeline_mode = #tpu.pipeline_mode<synchronous>, transform_indices = @transform_2, window_bounds = array<i64: 1, 128>}, {pipeline_mode = #tpu.pipeline_mode<synchronous>, transform_indices = @transform_3, window_bounds = array<i64: 128, 128>}, {pipeline_mode = #tpu.pipeline_mode<synchronous>, transform_indices = @transform_4, window_bounds = array<i64: 1, 128>}, {pipeline_mode = #tpu.pipeline_mode<synchronous>, transform_indices = @transform_5, window_bounds = array<i64: 128, 128>}, {pipeline_mode = #tpu.pipeline_mode<synchronous>, transform_indices = @transform_6, window_bounds = array<i64: 1, 128>}, {pipeline_mode = #tpu.pipeline_mode<synchronous>, transform_indices = @transform_7, window_bounds = array<i64: 128, 128>}, {pipeline_mode = #tpu.pipeline_mode<synchronous>, transform_indices = @transform_8, window_bounds = array<i64: 1, 128>}, {pipeline_mode = #tpu.pipeline_mode<synchronous>, transform_indices = @transform_9, window_bounds = array<i64: 128, 128>}, {pipeline_mode = #tpu.pipeline_mode<synchronous>, transform_indices = @transform_10, window_bounds = array<i64: 1, 128>}, {pipeline_mode = #tpu.pipeline_mode<synchronous>, transform_indices = @transform_11, window_bounds = array<i64: 128, 128>}, {pipeline_mode = #tpu.pipeline_mode<synchronous>, transform_indices = @transform_12, window_bounds = array<i64: 1, 128>}, {pipeline_mode = #tpu.pipeline_mode<synchronous>, transform_indices = @transform_13, window_bounds = array<i64: 128, 128>}, {pipeline_mode = #tpu.pipeline_mode<synchronous>, transform_indices = @transform_14, window_bounds = array<i64: 1, 128>}, {pipeline_mode = #tpu.pipeline_mode<synchronous>, transform_indices = @transform_15, window_bounds = array<i64: 128, 896>}, {pipeline_mode = #tpu.pipeline_mode<synchronous>, transform_indices = @transform_16, window_bounds = array<i64: 1, 896>}, {transform_indices = @transform_17, window_bounds = array<i64: 8, 896>}]} {
    %c0 = arith.constant 0 : index
    %c0_0 = arith.constant 0 : index
    %0 = vector.load %arg1[%c0, %c0_0] : memref<8x896xbf16, #tpu.memory_space<vmem>>, vector<8x896xbf16>
    %c0_1 = arith.constant 0 : index
    %c0_2 = arith.constant 0 : index
    %1 = vector.load %arg2[%c0_1, %c0_2] : memref<896x128xbf16, #tpu.memory_space<vmem>>, vector<896x128xbf16>
    %c0_3 = arith.constant 0 : index
    %c0_4 = arith.constant 0 : index
    %2 = vector.load %arg3[%c0_3, %c0_4] : memref<1x128xf32, #tpu.memory_space<vmem>>, vector<1x128xf32>
    %cst = arith.constant dense<0.000000e+00> : vector<8x128xf32>
    %3 = tpu.matmul %0, %1, %cst {dimension_numbers = #tpu.dot_dimension_numbers<[1], [0], [0], [1], [0, 0, 1, 1], [], []>} : vector<8x896xbf16>, vector<896x128xbf16>, vector<8x128xf32> -> vector<8x128xf32>
    %4 = vector.broadcast %2 : vector<1x128xf32> to vector<8x128xf32>
    %5 = arith.addf %3, %4 : vector<8x128xf32>
    %cst_5 = arith.constant 0.000000e+00 : f32
    %6 = vector.broadcast %cst_5 : f32 to vector<8x128xf32>
    %7 = arith.maximumf %5, %6 : vector<8x128xf32>
    %8 = arith.truncf %7 : vector<8x128xf32> to vector<8x128xbf16>
    %c0_6 = arith.constant 0 : index
    %c0_7 = arith.constant 0 : index
    %9 = vector.load %arg4[%c0_6, %c0_7] : memref<128x128xbf16, #tpu.memory_space<vmem>>, vector<128x128xbf16>
    %c0_8 = arith.constant 0 : index
    %c0_9 = arith.constant 0 : index
    %10 = vector.load %arg5[%c0_8, %c0_9] : memref<1x128xf32, #tpu.memory_space<vmem>>, vector<1x128xf32>
    %cst_10 = arith.constant dense<0.000000e+00> : vector<8x128xf32>
    %11 = tpu.matmul %8, %9, %cst_10 {dimension_numbers = #tpu.dot_dimension_numbers<[1], [0], [0], [1], [0, 0, 1, 1], [], []>} : vector<8x128xbf16>, vector<128x128xbf16>, vector<8x128xf32> -> vector<8x128xf32>
    %12 = vector.broadcast %10 : vector<1x128xf32> to vector<8x128xf32>
    %13 = arith.addf %11, %12 : vector<8x128xf32>
    %cst_11 = arith.constant 0.000000e+00 : f32
    %14 = vector.broadcast %cst_11 : f32 to vector<8x128xf32>
    %15 = arith.maximumf %13, %14 : vector<8x128xf32>
    %16 = arith.truncf %15 : vector<8x128xf32> to vector<8x128xbf16>
    %c0_12 = arith.constant 0 : index
    %c0_13 = arith.constant 0 : index
    %17 = vector.load %arg6[%c0_12, %c0_13] : memref<128x128xbf16, #tpu.memory_space<vmem>>, vector<128x128xbf16>
    %c0_14 = arith.constant 0 : index
    %c0_15 = arith.constant 0 : index
    %18 = vector.load %arg7[%c0_14, %c0_15] : memref<1x128xf32, #tpu.memory_space<vmem>>, vector<1x128xf32>
    %cst_16 = arith.constant dense<0.000000e+00> : vector<8x128xf32>
    %19 = tpu.matmul %16, %17, %cst_16 {dimension_numbers = #tpu.dot_dimension_numbers<[1], [0], [0], [1], [0, 0, 1, 1], [], []>} : vector<8x128xbf16>, vector<128x128xbf16>, vector<8x128xf32> -> vector<8x128xf32>
    %20 = vector.broadcast %18 : vector<1x128xf32> to vector<8x128xf32>
    %21 = arith.addf %19, %20 : vector<8x128xf32>
    %cst_17 = arith.constant 0.000000e+00 : f32
    %22 = vector.broadcast %cst_17 : f32 to vector<8x128xf32>
    %23 = arith.maximumf %21, %22 : vector<8x128xf32>
    %24 = arith.truncf %23 : vector<8x128xf32> to vector<8x128xbf16>
    %c0_18 = arith.constant 0 : index
    %c0_19 = arith.constant 0 : index
    %25 = vector.load %arg8[%c0_18, %c0_19] : memref<128x128xbf16, #tpu.memory_space<vmem>>, vector<128x128xbf16>
    %c0_20 = arith.constant 0 : index
    %c0_21 = arith.constant 0 : index
    %26 = vector.load %arg9[%c0_20, %c0_21] : memref<1x128xf32, #tpu.memory_space<vmem>>, vector<1x128xf32>
    %cst_22 = arith.constant dense<0.000000e+00> : vector<8x128xf32>
    %27 = tpu.matmul %24, %25, %cst_22 {dimension_numbers = #tpu.dot_dimension_numbers<[1], [0], [0], [1], [0, 0, 1, 1], [], []>} : vector<8x128xbf16>, vector<128x128xbf16>, vector<8x128xf32> -> vector<8x128xf32>
    %28 = vector.broadcast %26 : vector<1x128xf32> to vector<8x128xf32>
    %29 = arith.addf %27, %28 : vector<8x128xf32>
    %cst_23 = arith.constant 0.000000e+00 : f32
    %30 = vector.broadcast %cst_23 : f32 to vector<8x128xf32>
    %31 = arith.maximumf %29, %30 : vector<8x128xf32>
    %32 = arith.truncf %31 : vector<8x128xf32> to vector<8x128xbf16>
    %c0_24 = arith.constant 0 : index
    %c0_25 = arith.constant 0 : index
    %33 = vector.load %arg10[%c0_24, %c0_25] : memref<128x128xbf16, #tpu.memory_space<vmem>>, vector<128x128xbf16>
    %c0_26 = arith.constant 0 : index
    %c0_27 = arith.constant 0 : index
    %34 = vector.load %arg11[%c0_26, %c0_27] : memref<1x128xf32, #tpu.memory_space<vmem>>, vector<1x128xf32>
    %cst_28 = arith.constant dense<0.000000e+00> : vector<8x128xf32>
    %35 = tpu.matmul %32, %33, %cst_28 {dimension_numbers = #tpu.dot_dimension_numbers<[1], [0], [0], [1], [0, 0, 1, 1], [], []>} : vector<8x128xbf16>, vector<128x128xbf16>, vector<8x128xf32> -> vector<8x128xf32>
    %36 = vector.broadcast %34 : vector<1x128xf32> to vector<8x128xf32>
    %37 = arith.addf %35, %36 : vector<8x128xf32>
    %cst_29 = arith.constant 0.000000e+00 : f32
    %38 = vector.broadcast %cst_29 : f32 to vector<8x128xf32>
    %39 = arith.maximumf %37, %38 : vector<8x128xf32>
    %40 = arith.truncf %39 : vector<8x128xf32> to vector<8x128xbf16>
    %c0_30 = arith.constant 0 : index
    %c0_31 = arith.constant 0 : index
    %41 = vector.load %arg12[%c0_30, %c0_31] : memref<128x128xbf16, #tpu.memory_space<vmem>>, vector<128x128xbf16>
    %c0_32 = arith.constant 0 : index
    %c0_33 = arith.constant 0 : index
    %42 = vector.load %arg13[%c0_32, %c0_33] : memref<1x128xf32, #tpu.memory_space<vmem>>, vector<1x128xf32>
    %cst_34 = arith.constant dense<0.000000e+00> : vector<8x128xf32>
    %43 = tpu.matmul %40, %41, %cst_34 {dimension_numbers = #tpu.dot_dimension_numbers<[1], [0], [0], [1], [0, 0, 1, 1], [], []>} : vector<8x128xbf16>, vector<128x128xbf16>, vector<8x128xf32> -> vector<8x128xf32>
    %44 = vector.broadcast %42 : vector<1x128xf32> to vector<8x128xf32>
    %45 = arith.addf %43, %44 : vector<8x128xf32>
    %cst_35 = arith.constant 0.000000e+00 : f32
    %46 = vector.broadcast %cst_35 : f32 to vector<8x128xf32>
    %47 = arith.maximumf %45, %46 : vector<8x128xf32>
    %48 = arith.truncf %47 : vector<8x128xf32> to vector<8x128xbf16>
    %c0_36 = arith.constant 0 : index
    %c0_37 = arith.constant 0 : index
    %49 = vector.load %arg14[%c0_36, %c0_37] : memref<128x128xbf16, #tpu.memory_space<vmem>>, vector<128x128xbf16>
    %c0_38 = arith.constant 0 : index
    %c0_39 = arith.constant 0 : index
    %50 = vector.load %arg15[%c0_38, %c0_39] : memref<1x128xf32, #tpu.memory_space<vmem>>, vector<1x128xf32>
    %cst_40 = arith.constant dense<0.000000e+00> : vector<8x128xf32>
    %51 = tpu.matmul %48, %49, %cst_40 {dimension_numbers = #tpu.dot_dimension_numbers<[1], [0], [0], [1], [0, 0, 1, 1], [], []>} : vector<8x128xbf16>, vector<128x128xbf16>, vector<8x128xf32> -> vector<8x128xf32>
    %52 = vector.broadcast %50 : vector<1x128xf32> to vector<8x128xf32>
    %53 = arith.addf %51, %52 : vector<8x128xf32>
    %cst_41 = arith.constant 0.000000e+00 : f32
    %54 = vector.broadcast %cst_41 : f32 to vector<8x128xf32>
    %55 = arith.maximumf %53, %54 : vector<8x128xf32>
    %56 = arith.truncf %55 : vector<8x128xf32> to vector<8x128xbf16>
    %c0_42 = arith.constant 0 : index
    %c0_43 = arith.constant 0 : index
    %57 = vector.load %arg16[%c0_42, %c0_43] : memref<128x896xbf16, #tpu.memory_space<vmem>>, vector<128x896xbf16>
    %c0_44 = arith.constant 0 : index
    %c0_45 = arith.constant 0 : index
    %58 = vector.load %arg17[%c0_44, %c0_45] : memref<1x896xf32, #tpu.memory_space<vmem>>, vector<1x896xf32>
    %cst_46 = arith.constant dense<0.000000e+00> : vector<8x896xf32>
    %59 = tpu.matmul %56, %57, %cst_46 {dimension_numbers = #tpu.dot_dimension_numbers<[1], [0], [0], [1], [0, 0, 1, 1], [], []>} : vector<8x128xbf16>, vector<128x896xbf16>, vector<8x896xf32> -> vector<8x896xf32>
    %60 = vector.broadcast %58 : vector<1x896xf32> to vector<8x896xf32>
    %61 = arith.addf %59, %60 : vector<8x896xf32>
    %cst_47 = arith.constant 0.000000e+00 : f32
    %62 = vector.broadcast %cst_47 : f32 to vector<8x896xf32>
    %63 = arith.maximumf %61, %62 : vector<8x896xf32>
    %c0_48 = arith.constant 0 : index
    %c0_49 = arith.constant 0 : index
    %64 = vector.load %arg18[%c0_48, %c0_49] : memref<8x896xf32, #tpu.memory_space<vmem>>, vector<8x896xf32>
    tpu.vector_store %arg18[%c0_48, %c0_49], %63 {strides = array<i32>} : memref<8x896xf32, #tpu.memory_space<vmem>>, vector<8x896xf32>,
    return
  }
  func.func @transform_0(%arg0: i32) -> (i32, i32) {
    %c0_i32 = arith.constant 0 : i32
    %c0_i32_0 = arith.constant 0 : i32
    return %arg0, %c0_i32 : i32, i32
  }
  func.func @transform_1(%arg0: i32) -> (i32, i32) {
    %c0_i32 = arith.constant 0 : i32
    %c0_i32_0 = arith.constant 0 : i32
    %c0_i32_1 = arith.constant 0 : i32
    return %c0_i32, %c0_i32_0 : i32, i32
  }
  func.func @transform_2(%arg0: i32) -> (i32, i32) {
    %c0_i32 = arith.constant 0 : i32
    %c0_i32_0 = arith.constant 0 : i32
    %c0_i32_1 = arith.constant 0 : i32
    return %c0_i32, %c0_i32_0 : i32, i32
  }
  func.func @transform_3(%arg0: i32) -> (i32, i32) {
    %c0_i32 = arith.constant 0 : i32
    %c0_i32_0 = arith.constant 0 : i32
    %c0_i32_1 = arith.constant 0 : i32
    return %c0_i32, %c0_i32_0 : i32, i32
  }
  func.func @transform_4(%arg0: i32) -> (i32, i32) {
    %c0_i32 = arith.constant 0 : i32
    %c0_i32_0 = arith.constant 0 : i32
    %c0_i32_1 = arith.constant 0 : i32
    return %c0_i32, %c0_i32_0 : i32, i32
  }
  func.func @transform_5(%arg0: i32) -> (i32, i32) {
    %c0_i32 = arith.constant 0 : i32
    %c0_i32_0 = arith.constant 0 : i32
    %c0_i32_1 = arith.constant 0 : i32
    return %c0_i32, %c0_i32_0 : i32, i32
  }
  func.func @transform_6(%arg0: i32) -> (i32, i32) {
    %c0_i32 = arith.constant 0 : i32
    %c0_i32_0 = arith.constant 0 : i32
    %c0_i32_1 = arith.constant 0 : i32
    return %c0_i32, %c0_i32_0 : i32, i32
  }
  func.func @transform_7(%arg0: i32) -> (i32, i32) {
    %c0_i32 = arith.constant 0 : i32
    %c0_i32_0 = arith.constant 0 : i32
    %c0_i32_1 = arith.constant 0 : i32
    return %c0_i32, %c0_i32_0 : i32, i32
  }
  func.func @transform_8(%arg0: i32) -> (i32, i32) {
    %c0_i32 = arith.constant 0 : i32
    %c0_i32_0 = arith.constant 0 : i32
    %c0_i32_1 = arith.constant 0 : i32
    return %c0_i32, %c0_i32_0 : i32, i32
  }
  func.func @transform_9(%arg0: i32) -> (i32, i32) {
    %c0_i32 = arith.constant 0 : i32
    %c0_i32_0 = arith.constant 0 : i32
    %c0_i32_1 = arith.constant 0 : i32
    return %c0_i32, %c0_i32_0 : i32, i32
  }
  func.func @transform_10(%arg0: i32) -> (i32, i32) {
    %c0_i32 = arith.constant 0 : i32
    %c0_i32_0 = arith.constant 0 : i32
    %c0_i32_1 = arith.constant 0 : i32
    return %c0_i32, %c0_i32_0 : i32, i32
  }
  func.func @transform_11(%arg0: i32) -> (i32, i32) {
    %c0_i32 = arith.constant 0 : i32
    %c0_i32_0 = arith.constant 0 : i32
    %c0_i32_1 = arith.constant 0 : i32
    return %c0_i32, %c0_i32_0 : i32, i32
  }
  func.func @transform_12(%arg0: i32) -> (i32, i32) {
    %c0_i32 = arith.constant 0 : i32
    %c0_i32_0 = arith.constant 0 : i32
    %c0_i32_1 = arith.constant 0 : i32
    return %c0_i32, %c0_i32_0 : i32, i32
  }
  func.func @transform_13(%arg0: i32) -> (i32, i32) {
    %c0_i32 = arith.constant 0 : i32
    %c0_i32_0 = arith.constant 0 : i32
    %c0_i32_1 = arith.constant 0 : i32
    return %c0_i32, %c0_i32_0 : i32, i32
  }
  func.func @transform_14(%arg0: i32) -> (i32, i32) {
    %c0_i32 = arith.constant 0 : i32
    %c0_i32_0 = arith.constant 0 : i32
    %c0_i32_1 = arith.constant 0 : i32
    return %c0_i32, %c0_i32_0 : i32, i32
  }
  func.func @transform_15(%arg0: i32) -> (i32, i32) {
    %c0_i32 = arith.constant 0 : i32
    %c0_i32_0 = arith.constant 0 : i32
    %c0_i32_1 = arith.constant 0 : i32
    return %c0_i32, %c0_i32_0 : i32, i32
  }
  func.func @transform_16(%arg0: i32) -> (i32, i32) {
    %c0_i32 = arith.constant 0 : i32
    %c0_i32_0 = arith.constant 0 : i32
    %c0_i32_1 = arith.constant 0 : i32
    return %c0_i32, %c0_i32_0 : i32, i32
  }
  func.func @transform_17(%arg0: i32) -> (i32, i32) {
    %c0_i32 = arith.constant 0 : i32
    %c0_i32_0 = arith.constant 0 : i32
    return %arg0, %c0_i32 : i32, i32
  }
}

</mosaic_0001>

<bundles_post_ra>
// kernel: autoencoder_forward.1
= control target key start
LH: loop header
LB: loop body
LE: loop exit
PB: predicated region body
PF: predicated region fallthrough
CT: control target
= control target key end

     0   :  { %s3222_s0 = inlined_call_operand.vmem [shape: bf16[8,896], index: 0, kind: input, shape index: {}]   ;;  %s3223_s1 = inlined_call_operand.hbm [shape: bf16[896,128], index: 1, kind: input, shape index: {}]   ;;  %s3224_s2 = inlined_call_operand.hbm [shape: f32[1,128], index: 2, kind: input, shape index: {}]   ;;  %s3225_s3 = inlined_call_operand.hbm [shape: bf16[128,128], index: 3, kind: input, shape index: {}]   ;;  %s3226_s4 = inlined_call_operand.hbm [shape: f32[1,128], index: 4, kind: input, shape index: {}]   ;;  %s3227_s5 = inlined_call_operand.hbm [shape: bf16[128,128], index: 5, kind: input, shape index: {}]   ;;  %s3228_s6 = inlined_call_operand.hbm [shape: f32[1,128], index: 6, kind: input, shape index: {}]   ;;  %s3229_s7 = inlined_call_operand.hbm [shape: bf16[128,128], index: 7, kind: input, shape index: {}]   ;;  %s3230_s8 = inlined_call_operand.hbm [shape: f32[1,128], index: 8, kind: input, shape index: {}]   ;;  %s3231_s9 = inlined_call_operand.vmem [shape: bf16[128,128], index: 9, kind: input, shape index: {}]   ;;  %s3232_s10 = inlined_call_operand.hbm [shape: f32[1,128], index: 10, kind: input, shape index: {}]   ;;  %s3233_s11 = inlined_call_operand.hbm [shape: bf16[128,128], index: 11, kind: input, shape index: {}]   ;;  %s3234_s12 = inlined_call_operand.hbm [shape: f32[1,128], index: 12, kind: input, shape index: {}]   ;;  %s3235_s13 = inlined_call_operand.hbm [shape: bf16[128,128], index: 13, kind: input, shape index: {}]   ;;  %s3236_s14 = inlined_call_operand.hbm [shape: f32[1,128], index: 14, kind: input, shape index: {}]   ;;  %s3237_s15 = inlined_call_operand.hbm [shape: bf16[128,896], index: 15, kind: input, shape index: {}]   ;;  %s3238_s16 = inlined_call_operand.vmem [shape: f32[1,896], index: 16, kind: input, shape index: {}]   ;;  %s3239_s17 = inlined_call_operand.vmem [shape: f32[8,896], index: 17, kind: output, shape index: {}]  }
   0x1   :  { %3241 = sst [smem:[#allocation32_spill]] %s3222_s0 }
   0x2   :  { %3242 = sst [smem:[#allocation33_spill]] %s3223_s1 }
   0x3   :  { %22 = vsyncpa [#allocation3], 0 }
   0x4   :  { %23 = vsyncpa [#allocation5], 0 }
   0x5   :  { %24 = vsyncpa [#allocation8], 0 }
   0x6   :  { %25 = vsyncpa [#allocation11], 0 }
   0x7   :  { %26 = vsyncpa [#allocation14], 0 }
   0x8   :  { %27 = vsyncpa [#allocation17], 0 }
   0x9   :  { %28 = vsyncpa [#allocation20], 0  ;;  %s50_s26 = sshll.u32 %s3224_s2, 4  ;;  %s51_s26 = int_to_ptr.hbm [resolvable:$true] %s50_s26 }
   0xa   :  { %29 = vsyncpa [#allocation23], 0  ;;  %s2994_s27 = smov [#allocation4]   ;;  %s74_s30 = sshll.u32 %s3226_s4, 4  ;;  %s75_s30 = int_to_ptr.hbm [resolvable:$true] %s74_s30 }
   0xb   :  { %s52_s28 = sshll.u32 %s2994_s27, 4  ;;  %s2995_s18 = smov [#allocation7]   ;;  %s53_s28 = int_to_ptr.vmem [resolvable:$true] %s52_s28 }
   0xc   :  { %55 = dma.hbm_to_vmem [thread:$0]  %s51_s26, 16, %s53_s28, [#allocation5]  }
   0xd   :  { %s76_s19 = sshll.u32 %s2995_s18, 4  ;;  %s98_s21 = sshll.u32 %s3228_s6, 4  ;;  %s77_s19 = int_to_ptr.vmem [resolvable:$true] %s76_s19  ;;  %s99_s21 = int_to_ptr.hbm [resolvable:$true] %s98_s21 }
   0xe   :  { %79 = dma.hbm_to_vmem [thread:$0]  %s75_s30, 16, %s77_s19, [#allocation8]  }
   0xf   :  { %s122_s23 = sshll.u32 %s3230_s8, 4  ;;  %s2996_s24 = smov [#allocation10]   ;;  %s123_s23 = int_to_ptr.hbm [resolvable:$true] %s122_s23 }
  0x10   :  { %s100_s25 = sshll.u32 %s2996_s24, 4  ;;  %s2997_s4 = smov [#allocation13]   ;;  %s101_s25 = int_to_ptr.vmem [resolvable:$true] %s100_s25 }
  0x11   :  { %103 = dma.hbm_to_vmem [thread:$0]  %s99_s21, 16, %s101_s25, [#allocation11]  }
  0x12   :  { %s124_s26 = sshll.u32 %s2997_s4, 4  ;;  %s145_s6 = sshll.u32 %s3233_s11, 4  ;;  %s125_s26 = int_to_ptr.vmem [resolvable:$true] %s124_s26  ;;  %s146_s6 = int_to_ptr.hbm [resolvable:$true] %s145_s6 }
  0x13   :  { %127 = dma.hbm_to_vmem [thread:$0]  %s123_s23, 16, %s125_s26, [#allocation14]  }
  0x14   :  { %s2998_s29 = smov [#allocation16]   ;;  %s169_s8 = sshll.u32 %s3235_s13, 4  ;;  %s170_s8 = int_to_ptr.hbm [resolvable:$true] %s169_s8 }
  0x15   :  { %s147_s0 = sshll.u32 %s2998_s29, 4  ;;  %s2999_s19 = smov 64   ;;  %s148_s0 = int_to_ptr.vmem [resolvable:$true] %s147_s0 }
  0x16   :  { %s3000_s1 = smov 4   ;;  %s3001_s20 = smov [#allocation19]  }
  0x17   :  { %153 = dma.hbm_to_vmem [thread:$0]  %s146_s6, 1024, %s148_s0, [#allocation17], %s2999_s19, %s2999_s19, %s3000_s1  }
  0x18   :  { %s171_s21 = sshll.u32 %s3001_s20, 4  ;;  %s3243_s11 = sld [smem:[#allocation33_spill]]  ;;  %s172_s21 = int_to_ptr.vmem [resolvable:$true] %s171_s21 }
  0x19   :  { %177 = dma.hbm_to_vmem [thread:$0]  %s170_s8, 1024, %s172_s21, [#allocation20], %s2999_s19, %s2999_s19, %s3000_s1  }
  0x1a   :  { %s60_s25 = sshll.u32 %s3225_s3, 4  ;;  %s3002_s4 = smov [#allocation2]   ;;  %s61_s25 = int_to_ptr.hbm [resolvable:$true] %s60_s25 }
  0x1b   :  { %s38_s26 = sshll.u32 %s3002_s4, 4  ;;  %s3003_s27 = smov [#allocation6]   ;;  %s39_s26 = int_to_ptr.vmem [resolvable:$true] %s38_s26 }
  0x1c   :  { %s62_s28 = sshll.u32 %s3003_s27, 4  ;;  %s84_s0 = sshll.u32 %s3227_s5, 4  ;;  %s63_s28 = int_to_ptr.vmem [resolvable:$true] %s62_s28  ;;  %s85_s0 = int_to_ptr.hbm [resolvable:$true] %s84_s0 }
  0x1d   :  { %68 = dma.hbm_to_vmem [thread:$0]  %s61_s25, 1024, %s63_s28, [#allocation5], %s2999_s19, %s2999_s19, %s3000_s1  }
  0x1e   :  { %s36_s23 = sshll.u32 %s3243_s11, 4  ;;  %s108_s18 = sshll.u32 %s3229_s7, 4  ;;  %s37_s23 = int_to_ptr.hbm [resolvable:$true] %s36_s23  ;;  %s109_s18 = int_to_ptr.hbm [resolvable:$true] %s108_s18 }
  0x1f   :  { %44 = dma.hbm_to_vmem [thread:$0]  %s37_s23, 7168, %s39_s26, [#allocation3], %s2999_s19, %s2999_s19, %s3000_s1  }
  0x20   :  { %s3004_s8 = smov [#allocation9]   ;;  %s3005_s21 = smov [#allocation12]  }
  0x21   :  { %s86_s20 = sshll.u32 %s3004_s8, 4  ;;  %s110_s5 = sshll.u32 %s3005_s21, 4  ;;  %s87_s20 = int_to_ptr.vmem [resolvable:$true] %s86_s20  ;;  %s111_s5 = int_to_ptr.vmem [resolvable:$true] %s110_s5 }
  0x22   :  { %92 = dma.hbm_to_vmem [thread:$0]  %s85_s0, 1024, %s87_s20, [#allocation8], %s2999_s19, %s2999_s19, %s3000_s1  }
  0x23   :  { %s135_s11 = sshll.u32 %s3232_s10, 4  ;;  %s159_s13 = sshll.u32 %s3234_s12, 4  ;;  %s136_s11 = int_to_ptr.hbm [resolvable:$true] %s135_s11  ;;  %s160_s13 = int_to_ptr.hbm [resolvable:$true] %s159_s13 }
  0x24   :  { %116 = dma.hbm_to_vmem [thread:$0]  %s109_s18, 1024, %s111_s5, [#allocation11], %s2999_s19, %s2999_s19, %s3000_s1  }
  0x25   :  { %s3006_s24 = smov [#allocation15]   ;;  %s3007_s4 = smov [#allocation18]  }
  0x26   :  { %s137_s25 = sshll.u32 %s3006_s24, 4  ;;  %s161_s26 = sshll.u32 %s3007_s4, 4  ;;  %s138_s25 = int_to_ptr.vmem [resolvable:$true] %s137_s25  ;;  %s162_s26 = int_to_ptr.vmem [resolvable:$true] %s161_s26 }
  0x27   :  { %140 = dma.hbm_to_vmem [thread:$0]  %s136_s11, 16, %s138_s25, [#allocation14]  }
  0x28   :  { %s183_s10 = sshll.u32 %s3236_s14, 4  ;;  %s193_s1 = sshll.u32 %s3237_s15, 4  ;;  %s184_s10 = int_to_ptr.hbm [resolvable:$true] %s183_s10  ;;  %s194_s1 = int_to_ptr.hbm [resolvable:$true] %s193_s1 }
  0x29   :  { %164 = dma.hbm_to_vmem [thread:$0]  %s160_s13, 16, %s162_s26, [#allocation17]  }
  0x2a   :  { %s3008_s29 = smov [#allocation21]   ;;  %s3009_s0 = smov [#allocation22]  }
  0x2b   :  { %s185_s12 = sshll.u32 %s3008_s29, 4  ;;  %s195_s3 = sshll.u32 %s3009_s0, 4  ;;  %s186_s12 = int_to_ptr.vmem [resolvable:$true] %s185_s12  ;;  %s196_s3 = int_to_ptr.vmem [resolvable:$true] %s195_s3 }
  0x2c   :  { %188 = dma.hbm_to_vmem [thread:$0]  %s184_s10, 16, %s186_s12, [#allocation20]  }
  0x2d   :  { %s3010_s30 = smov 448   ;;  %s3011_s18 = smov 28  }
  0x2e   :  { %201 = dma.hbm_to_vmem [thread:$0]  %s194_s1, 7168, %s196_s3, [#allocation23], %s3010_s30, %s3010_s30, %s3011_s18  }
  0x2f   :  { %2978 = dma.done.wait [#allocation3], 7168  }
  0x30   :  { %2979 = vsyncadd [#allocation3], 4294960128 }
  0x31   :  { %2980 = dma.done.wait [#allocation5], 1040  }
  0x32   :  { %2981 = vsyncadd [#allocation5], 4294966256 }
  0x33   :  { %2982 = dma.done.wait [#allocation8], 1040  }
  0x34   :  { %2983 = vsyncadd [#allocation8], 4294966256 }
  0x35   :  { %2984 = dma.done.wait [#allocation11], 1040  }
  0x36   :  { %2985 = vsyncadd [#allocation11], 4294966256 }
  0x37   :  { %2986 = dma.done.wait [#allocation14], 32  }
  0x38   :  { %2987 = vsyncadd [#allocation14], 4294967264 }
  0x39   :  { %2988 = dma.done.wait [#allocation17], 1040  }
  0x3a   :  { %2989 = vsyncadd [#allocation17], 4294966256 }
  0x3b   :  { %2990 = dma.done.wait [#allocation20], 1040  }
  0x3c   :  { %2991 = vsyncadd [#allocation20], 4294966256 }
  0x3d   :  { %2992 = dma.done.wait [#allocation23], 7168  }
  0x3e   :  { %2993 = vsyncadd [#allocation23], 4294960128  ;;  %v2464_v0 = vld [vmem:[#allocation2 + $0x38] sm:$0xff]  ;;  %v2463_v3 = vld [vmem:[#allocation2 + $0x30] sm:$0xff]  ;;  %s3244_s8 = sld [smem:[#allocation32_spill]] }
  0x3f   :  { %v2472_v1 = vld [vmem:[#allocation2 + $0x78] sm:$0xff]  ;;  %741 = vmatpush.bf16.msra.mxu0 %v2464_v0  ;;  %v2471_v4 = vld [vmem:[#allocation2 + $0x70] sm:$0xff]  ;;  %v2462_v7 = vld [vmem:[#allocation2 + $0x28] sm:$0xff] }
  0x40   :  { %v2480_v2 = vld [vmem:[#allocation2 + $0xb8] sm:$0xff]  ;;  %754 = vmatpush.bf16.msra.mxu1 %v2472_v1  ;;  %v2479_v5 = vld [vmem:[#allocation2 + $0xb0] sm:$0xff]  ;;  %v2470_v8 = vld [vmem:[#allocation2 + $0x68] sm:$0xff] }
  0x41   :  { %767 = vmatpush.bf16.msra.mxu2 %v2480_v2  ;;  %v2488_v6 = vld [vmem:[#allocation2 + $0xf8] sm:$0xff]  ;;  %v2478_v9 = vld [vmem:[#allocation2 + $0xa8] sm:$0xff]  ;;  %v2487_v10 = vld [vmem:[#allocation2 + $0xf0] sm:$0xff] }
  0x42   :  { %780 = vmatpush.bf16.msra.mxu3 %v2488_v6  ;;  %v2461_v11 = vld [vmem:[#allocation2 + $0x20] sm:$0xff]  ;;  %v2486_v14 = vld [vmem:[#allocation2 + $0xe8] sm:$0xff]  ;;  %v2460_v15 = vld [vmem:[#allocation2 + $0x18] sm:$0xff] }
  0x43   :  { %742 = vmatpush.bf16.msra.mxu0 %v2463_v3  ;;  %v2469_v12 = vld [vmem:[#allocation2 + $0x60] sm:$0xff]  ;;  %v2468_v16 = vld [vmem:[#allocation2 + $0x58] sm:$0xff]  ;;  %v2459_v19 = vld [vmem:[#allocation2 + $0x10] sm:$0xff] }
  0x44   :  { %755 = vmatpush.bf16.msra.mxu1 %v2471_v4  ;;  %v2477_v13 = vld [vmem:[#allocation2 + $0xa0] sm:$0xff]  ;;  %v2476_v17 = vld [vmem:[#allocation2 + $0x98] sm:$0xff]  ;;  %v2467_v20 = vld [vmem:[#allocation2 + $0x50] sm:$0xff] }
  0x45   :  { %768 = vmatpush.bf16.msra.mxu2 %v2479_v5  ;;  %v2485_v18 = vld [vmem:[#allocation2 + $0xe0] sm:$0xff]  ;;  %v2475_v21 = vld [vmem:[#allocation2 + $0x90] sm:$0xff]  ;;  %v2484_v22 = vld [vmem:[#allocation2 + $0xd8] sm:$0xff] }
  0x46   :  { %781 = vmatpush.bf16.msra.mxu3 %v2487_v10  ;;  %v2458_v23 = vld [vmem:[#allocation2 + $0x8] sm:$0xff]  ;;  %v260_v25 = vld [vmem:[%s3244_s8] sm:$0xff]  ;;  %v2483_v27 = vld [vmem:[#allocation2 + $0xd0] sm:$0xff] }
  0x47   :  { %743 = vmatpush.bf16.msra.mxu0 %v2462_v7  ;;  %v2466_v24 = vld [vmem:[#allocation2 + $0x48] sm:$0xff]  ;;  %v384_v29 = vunpack.c.l.b16 %v260_v25  ;;  %v2457_v30 = vld [vmem:[#allocation2] sm:$0xff]  ;;  %v385_v33 = vunpack.c.h.b16 %v260_v25  ;;  %v2496_v35 = vld [vmem:[#allocation2 + $0x138] sm:$0xff] }
  0x48   :  { %756 = vmatpush.bf16.msra.mxu1 %v2470_v8  ;;  %v2474_v26 = vld [vmem:[#allocation2 + $0x88] sm:$0xff]  ;;  %v2465_v31 = vld [vmem:[#allocation2 + $0x40] sm:$0xff]  ;;  %v2504_v36 = vld [vmem:[#allocation2 + $0x178] sm:$0xff] }
  0x49   :  { %769 = vmatpush.bf16.msra.mxu2 %v2478_v9  ;;  %v261_v28 = vld [vmem:[%s3244_s8 + $0x8] sm:$0xff]  ;;  %v2473_v34 = vld [vmem:[#allocation2 + $0x80] sm:$0xff]  ;;  %v2512_v37 = vld [vmem:[#allocation2 + $0x1b8] sm:$0xff]  ;;  %v391_v38 = vpack.c.b16 %v384_v29, %v384_v29  ;;  %v392_v41 = vpack.c.b16 %v385_v33, %v385_v33 }
  0x4a   :  { %782 = vmatpush.bf16.msra.mxu3 %v2486_v14  ;;  %v386_v32 = vunpack.c.l.b16 %v261_v28  ;;  %v2482_v39 = vld [vmem:[#allocation2 + $0xc8] sm:$0xff]  ;;  %v2495_v42 = vld [vmem:[#allocation2 + $0x130] sm:$0xff]  ;;  %v2481_v45 = vld [vmem:[#allocation2 + $0xc0] sm:$0xff]  ;;  %v387_v46 = vunpack.c.h.b16 %v261_v28 }
  0x4b   :  { %744 = vmatpush.bf16.msra.mxu0 %v2461_v11  ;;  %v2503_v43 = vld [vmem:[#allocation2 + $0x170] sm:$0xff]  ;;  %v2494_v47 = vld [vmem:[#allocation2 + $0x128] sm:$0xff]  ;;  %v2493_v51 = vld [vmem:[#allocation2 + $0x120] sm:$0xff] }
  0x4c   :  { %757 = vmatpush.bf16.msra.mxu1 %v2469_v12  ;;  %v393_v40 = vpack.c.b16 %v386_v32, %v386_v32  ;;  %v2511_v44 = vld [vmem:[#allocation2 + $0x1b0] sm:$0xff]  ;;  %v2502_v48 = vld [vmem:[#allocation2 + $0x168] sm:$0xff]  ;;  %v394_v50 = vpack.c.b16 %v387_v46, %v387_v46  ;;  %v2501_v52 = vld [vmem:[#allocation2 + $0x160] sm:$0xff] }
  0x4d   :  { %770 = vmatpush.bf16.msra.mxu2 %v2477_v13  ;;  %v2510_v49 = vld [vmem:[#allocation2 + $0x1a8] sm:$0xff]  ;;  %v2509_v53 = vld [vmem:[#allocation2 + $0x1a0] sm:$0xff]  ;;  %v2492_v54 = vld [vmem:[#allocation2 + $0x118] sm:$0xff] }
  0x4e   :  { %783 = vmatpush.bf16.msra.mxu3 %v2485_v18  ;;  %v2500_v55 = vld [vmem:[#allocation2 + $0x158] sm:$0xff]  ;;  %v2491_v57 = vld [vmem:[#allocation2 + $0x110] sm:$0xff]  ;;  %v2490_v60 = vld [vmem:[#allocation2 + $0x108] sm:$0xff] }
  0x4f   :  { %745 = vmatpush.bf16.msra.mxu0 %v2460_v15  ;;  %v2508_v56 = vld [vmem:[#allocation2 + $0x198] sm:$0xff]  ;;  %v2499_v58 = vld [vmem:[#allocation2 + $0x150] sm:$0xff]  ;;  %v2498_v62 = vld [vmem:[#allocation2 + $0x148] sm:$0xff] }
  0x50   :  { %758 = vmatpush.bf16.msra.mxu1 %v2468_v16  ;;  %v2507_v59 = vld [vmem:[#allocation2 + $0x190] sm:$0xff]  ;;  %v2506_v63 = vld [vmem:[#allocation2 + $0x188] sm:$0xff]  ;;  %v263_v0 = vld [vmem:[%s3244_s8 + $0x18] sm:$0xf] }
  0x51   :  { %771 = vmatpush.bf16.msra.mxu2 %v2476_v17  ;;  %v262_v61 = vld [vmem:[%s3244_s8 + $0x10] sm:$0xff]  ;;  %v2489_v2 = vld [vmem:[#allocation2 + $0x100] sm:$0xff]  ;;  %v390_v4 = vunpack.c.l.b16 %v263_v0  ;;  %v2544_v0 = vld [vmem:[%s3231_s9 + $0x38] sm:$0xff] }
  0x52   :  { %784 = vmatpush.bf16.msra.mxu3 %v2484_v22  ;;  %v388_v1 = vunpack.c.l.b16 %v262_v61  ;;  %v389_v3 = vunpack.c.h.b16 %v262_v61  ;;  %v2497_v5 = vld [vmem:[#allocation2 + $0x140] sm:$0xff]  ;;  %v2519_v11 = vld [vmem:[#allocation6 + $0x30] sm:$0xff]  ;;  %v2518_v12 = vld [vmem:[#allocation6 + $0x28] sm:$0xff] }
  0x53   :  { %746 = vmatpush.bf16.msra.mxu0 %v2459_v19  ;;  %v2505_v6 = vld [vmem:[#allocation2 + $0x180] sm:$0xff]  ;;  %v397_v9 = vpack.c.b16 %v390_v4, %v390_v4  ;;  %v2515_v15 = vld [vmem:[#allocation6 + $0x10] sm:$0xff]  ;;  %v2514_v18 = vld [vmem:[#allocation6 + $0x8] sm:$0xff] }
  0x54   :  { %759 = vmatpush.bf16.msra.mxu1 %v2467_v20  ;;  %v395_v7 = vpack.c.b16 %v388_v1, %v388_v1  ;;  %v396_v8 = vpack.c.b16 %v389_v3, %v389_v3  ;;  %v2520_v10 = vld [vmem:[#allocation6 + $0x38] sm:$0xff]  ;;  %v2517_v13 = vld [vmem:[#allocation6 + $0x20] sm:$0xff]  ;;  %v2526_v29 = vld [vmem:[#allocation9 + $0x28] sm:$0xff] }
  0x55   :  { %772 = vmatpush.bf16.msra.mxu2 %v2475_v21  ;;  %v2516_v14 = vld [vmem:[#allocation6 + $0x18] sm:$0xff]  ;;  %v2513_v19 = vld [vmem:[#allocation6] sm:$0xff]  ;;  %v2543_v1 = vld [vmem:[%s3231_s9 + $0x30] sm:$0xff] }
  0x56   :  { %785 = vmatpush.bf16.msra.mxu3 %v2483_v27  ;;  %v2525_v32 = vld [vmem:[#allocation9 + $0x20] sm:$0xff]  ;;  %v2540_v4 = vld [vmem:[%s3231_s9 + $0x18] sm:$0xff] }
  0x57   :  { %747 = vmatpush.bf16.msra.mxu0 %v2458_v23  ;;  %v2528_v23 = vld [vmem:[#allocation9 + $0x38] sm:$0xff] }
  0x58   :  { %760 = vmatpush.bf16.msra.mxu1 %v2466_v24  ;;  %v2635_v24 = vld [vmem:[#allocation4] ss:$0 sm:$0xff] }
  0x59   :  { %773 = vmatpush.bf16.msra.mxu2 %v2474_v26  ;;  %v2527_v26 = vld [vmem:[#allocation9 + $0x30] sm:$0xff]  ;;  %v2541_v3 = vld [vmem:[%s3231_s9 + $0x20] sm:$0xff] }
  0x5a   :  { %786 = vmatpush.bf16.msra.mxu3 %v2482_v39 }
  0x5b   :  { %748 = vmatpush.bf16.msra.mxu0 %v2457_v30 }
  0x5c   :  { %761 = vmatpush.bf16.msra.mxu1 %v2465_v31 }
  0x5d   :  { %774 = vmatpush.bf16.msra.mxu2 %v2473_v34  ;;  %v2524_v34 = vld [vmem:[#allocation9 + $0x18] sm:$0xff] }
  0x5e   :  { %749 = vmatmul.bf16.vlgmr.msra.gmra.mxu0 %v391_v38  ;;  %787 = vmatpush.bf16.msra.mxu3 %v2481_v45  ;;  %v2523_v38 = vld [vmem:[#allocation9 + $0x10] sm:$0xff] }
  0x5f   :  { %793 = vmatpush.bf16.msrb.mxu0 %v2496_v35  ;;  %762 = vmatmul.bf16.vlgmr.msra.gmra.mxu1 %v392_v41 }
  0x60   :  { %806 = vmatpush.bf16.msrb.mxu1 %v2504_v36  ;;  %775 = vmatmul.bf16.vlgmr.msra.gmra.mxu2 %v393_v40 }
  0x61   :  { %819 = vmatpush.bf16.msrb.mxu2 %v2512_v37  ;;  %788 = vmatmul.bf16.vlgmr.msra.gmra.mxu3 %v394_v50  ;;  %v2536_v50 = vld [vmem:[#allocation12 + $0x38] sm:$0xff] }
  0x62   :  { %902 = vmatpush.bf16.msrb.mxu3 %v2520_v10 }
  0x63   :  { %794 = vmatpush.bf16.msrb.mxu0 %v2495_v42 }
  0x64   :  { %807 = vmatpush.bf16.msrb.mxu1 %v2503_v43 }
  0x65   :  { %820 = vmatpush.bf16.msrb.mxu2 %v2511_v44 }
  0x66   :  { %903 = vmatpush.bf16.msrb.mxu3 %v2519_v11 }
  0x67   :  { %795 = vmatpush.bf16.msrb.mxu0 %v2494_v47 }
  0x68   :  { %808 = vmatpush.bf16.msrb.mxu1 %v2502_v48  ;;  %v2522_v48 = vld [vmem:[#allocation9 + $0x8] sm:$0xff] }
  0x69   :  { %821 = vmatpush.bf16.msrb.mxu2 %v2510_v49  ;;  %v2521_v49 = vld [vmem:[#allocation9] sm:$0xff] }
  0x6a   :  { %904 = vmatpush.bf16.msrb.mxu3 %v2518_v12  ;;  %v2538_v12 = vld [vmem:[%s3231_s9 + $0x8] sm:$0xff] }
  0x6b   :  { %796 = vmatpush.bf16.msrb.mxu0 %v2493_v51  ;;  %v2535_v51 = vld [vmem:[#allocation12 + $0x30] sm:$0xff] }
  0x6c   :  { %809 = vmatpush.bf16.msrb.mxu1 %v2501_v52  ;;  %v2534_v52 = vld [vmem:[#allocation12 + $0x28] sm:$0xff] }
  0x6d   :  { %822 = vmatpush.bf16.msrb.mxu2 %v2509_v53  ;;  %v2533_v53 = vld [vmem:[#allocation12 + $0x20] sm:$0xff] }
  0x6e   :  { %905 = vmatpush.bf16.msrb.mxu3 %v2517_v13  ;;  %v2537_v13 = vld [vmem:[%s3231_s9] sm:$0xff] }
  0x6f   :  { %797 = vmatpush.bf16.msrb.mxu0 %v2492_v54  ;;  %v2532_v54 = vld [vmem:[#allocation12 + $0x18] sm:$0xff] }
  0x70   :  { %810 = vmatpush.bf16.msrb.mxu1 %v2500_v55  ;;  %v2531_v55 = vld [vmem:[#allocation12 + $0x10] sm:$0xff] }
  0x71   :  { %823 = vmatpush.bf16.msrb.mxu2 %v2508_v56  ;;  %v2636_v56 = vld [vmem:[#allocation7] ss:$0 sm:$0xff] }
  0x72   :  { %906 = vmatpush.bf16.msrb.mxu3 %v2516_v14  ;;  %v2552_v14 = vld [vmem:[#allocation16 + $0x38] sm:$0xff] }
  0x73   :  { %798 = vmatpush.bf16.msrb.mxu0 %v2491_v57 }
  0x74   :  { %811 = vmatpush.bf16.msrb.mxu1 %v2499_v58 }
  0x75   :  { %824 = vmatpush.bf16.msrb.mxu2 %v2507_v59 }
  0x76   :  { %907 = vmatpush.bf16.msrb.mxu3 %v2515_v15  ;;  %v2551_v15 = vld [vmem:[#allocation16 + $0x30] sm:$0xff] }
  0x77   :  { %799 = vmatpush.bf16.msrb.mxu0 %v2490_v60 }
  0x78   :  { %812 = vmatpush.bf16.msrb.mxu1 %v2498_v62  ;;  %v2530_v62 = vld [vmem:[#allocation12 + $0x8] sm:$0xff] }
  0x79   :  { %825 = vmatpush.bf16.msrb.mxu2 %v2506_v63  ;;  %v2529_v63 = vld [vmem:[#allocation12] sm:$0xff] }
  0x7a   :  { %908 = vmatpush.bf16.msrb.mxu3 %v2514_v18  ;;  %v2548_v18 = vld [vmem:[#allocation16 + $0x18] sm:$0xff] }
  0x7b   :  { %800 = vmatpush.bf16.msrb.mxu0 %v2489_v2  ;;  %v2542_v2 = vld [vmem:[%s3231_s9 + $0x28] sm:$0xff] }
  0x7c   :  { %813 = vmatpush.bf16.msrb.mxu1 %v2497_v5  ;;  %v2539_v5 = vld [vmem:[%s3231_s9 + $0x10] sm:$0xff] }
  0x7d   :  { %826 = vmatpush.bf16.msrb.mxu2 %v2505_v6  ;;  %v2637_v6 = vld [vmem:[#allocation10] ss:$0 sm:$0xff] }
  0x7e   :  { %801 = vmatmul.bf16.vlgmr.msrb.gmra.mxu0 %v395_v7  ;;  %909 = vmatpush.bf16.msrb.mxu3 %v2513_v19  ;;  %v2547_v19 = vld [vmem:[#allocation16 + $0x10] sm:$0xff] }
  0x7f   :  { %814 = vmatmul.bf16.vlgmr.msrb.gmra.mxu1 %v396_v8  ;;  %985 = vmatpush.bf16.msra.mxu0 %v2528_v23 }
  0x80   :  { %827 = vmatmul.bf16.vlgmr.msrb.gmra.mxu2 %v397_v9  ;;  %1068 = vmatpush.bf16.msra.mxu1 %v2536_v50 }
  0x81   :  { %1151 = vmatpush.bf16.msra.mxu2 %v2544_v0  ;;  %v2383_v0 = vld [vmem:[#allocation22 + $0x120] sm:$0xf] }
  0x82   :  { %1234 = vmatpush.bf16.msra.mxu3 %v2552_v14  ;;  %v2604_v14 = vld [vmem:[#allocation22 + $0x15c] sm:$0xf] }
  0x83   :  { %986 = vmatpush.bf16.msra.mxu0 %v2527_v26  ;;  %v2546_v26 = vld [vmem:[#allocation16 + $0x8] sm:$0xff] }
  0x84   :  { %1069 = vmatpush.bf16.msra.mxu1 %v2535_v51  ;;  %v2403_v51 = vld [vmem:[#allocation22 + $0x150] sm:$0xf] }
  0x85   :  { %1152 = vmatpush.bf16.msra.mxu2 %v2543_v1  ;;  %v2600_v1 = vld [vmem:[#allocation22 + $0x138] sm:$0xf0] }
  0x86   :  { %1235 = vmatpush.bf16.msra.mxu3 %v2551_v15 }
  0x87   :  { %987 = vmatpush.bf16.msra.mxu0 %v2526_v29  ;;  %v2559_v29 = vld [vmem:[#allocation19 + $0x30] sm:$0xff] }
  0x88   :  { %1070 = vmatpush.bf16.msra.mxu1 %v2534_v52  ;;  %v2606_v52 = vld [vmem:[#allocation22 + $0x168] sm:$0xf0] }
  0x89   :  { %1153 = vmatpush.bf16.msra.mxu2 %v2542_v2 }
  0x8b   :  { %988 = vmatpush.bf16.msra.mxu0 %v2525_v32  ;;  %v2556_v32 = vld [vmem:[#allocation19 + $0x18] sm:$0xff] }
  0x8c   :  { %1071 = vmatpush.bf16.msra.mxu1 %v2533_v53  ;;  %v2603_v53 = vld [vmem:[#allocation22 + $0x154] sm:$0xf] }
  0x8d   :  { %1154 = vmatpush.bf16.msra.mxu2 %v2541_v3  ;;  %v2347_v3 = vld [vmem:[#allocation22 + $0xe0] sm:$0xf] }
  0x8f   :  { %989 = vmatpush.bf16.msra.mxu0 %v2524_v34  ;;  %v2639_v34 = vld [vmem:[#allocation15] ss:$0 sm:$0xff] }
  0x90   :  { %1072 = vmatpush.bf16.msra.mxu1 %v2532_v54  ;;  %v2404_v54 = vor.u32 %v2606_v52, %v2403_v51  ;;  %v2271_v51 = vld [vmem:[#allocation22 + $0x40] sm:$0xf]  ;;  %v2572_v52 = vld [vmem:[#allocation22 + $0x58] sm:$0xf0] }
  0x91   :  { %1155 = vmatpush.bf16.msra.mxu2 %v2540_v4  ;;  %v2592_v4 = vld [vmem:[#allocation22 + $0xf8] sm:$0xf0] }
  0x92   :  { %v2348_v15 = vor.u32 %v2592_v4, %v2347_v3  ;;  %v2612_v3 = vld [vmem:[#allocation22 + $0x19c] sm:$0xf]  ;;  %v2449_v4 = vld [vmem:[#allocation22 + $0x1b4] sm:$0xf0] }
  0x93   :  { %990 = vmatpush.bf16.msra.mxu0 %v2523_v38 }
  0x94   :  { %1073 = vmatpush.bf16.msra.mxu1 %v2531_v55  ;;  %v2405_v55 = vld [vmem:[#allocation22 + $0x16c] sm:$0xf0] }
  0x95   :  { %1156 = vmatpush.bf16.msra.mxu2 %v2539_v5 }
  0x97   :  { %991 = vmatpush.bf16.msra.mxu0 %v2522_v48  ;;  %v2614_v48 = vld [vmem:[#allocation22 + $0x1a8] sm:$0xf0] }
  0x98   :  { %1074 = vmatpush.bf16.msra.mxu1 %v2530_v62  ;;  %v2596_v62 = vld [vmem:[#allocation22 + $0x11c] sm:$0xf] }
  0x99   :  { %1157 = vmatpush.bf16.msra.mxu2 %v2538_v12  ;;  %v2593_v12 = vld [vmem:[#allocation22 + $0x100] sm:$0xf0] }
  0x9b   :  { %992 = vmatpush.bf16.msra.mxu0 %v2521_v49 }
  0x9c   :  { %1075 = vmatpush.bf16.msra.mxu1 %v2529_v63  ;;  %v2377_v63 = vld [vmem:[#allocation22 + $0x134] sm:$0xf0] }
  0x9d   :  { %1158 = vmatpush.bf16.msra.mxu2 %v2537_v13  ;;  %v2380_v5 = vor.u32 %v2596_v62, %v2377_v63  ;;  %v2243_v62 = vld [vmem:[#allocation22 + $0x8] sm:$0xf]  ;;  %v2565_v63 = vld [vmem:[#allocation22 + $0x20] sm:$0xf0] }
  0xdb   :  { %v750_v16 = vpop.f32.mrf.mxu0 }
  0xdc   :  { %v763_v17 = vpop.f32.mrf.mxu1  ;;  %v751_v28 = vadd.f32 %v2635_v24, %v750_v16  ;;  %v2550_v16 = vld [vmem:[#allocation16 + $0x28] sm:$0xff] }
  0xdd   :  { %1236 = vmatpush.bf16.msra.mxu3 %v2550_v16  ;;  %v2319_v16 = vld [vmem:[#allocation22 + $0xa8] sm:$0xf] }
  0xde   :  { %v764_v30 = vadd.f32 %v763_v17, %v751_v28  ;;  %v2549_v17 = vld [vmem:[#allocation16 + $0x20] sm:$0xff] }
  0xdf   :  { %v2560_v28 = vld [vmem:[#allocation19 + $0x38] sm:$0xff] }
  0xe0   :  { %1317 = vmatpush.bf16.msrb.mxu0 %v2560_v28 }
  0xe1   :  { %1237 = vmatpush.bf16.msra.mxu3 %v2549_v17  ;;  %v2585_v17 = vld [vmem:[#allocation22 + $0xc0] sm:$0xf0] }
  0xe2   :  { %v2320_v28 = vor.u32 %v2585_v17, %v2319_v16  ;;  %v2419_v16 = vld [vmem:[#allocation22 + $0x160] sm:$0xf] }
  0xe3   :  { %v776_v20 = vpop.f32.mrf.mxu2  ;;  %v752_v21 = vpop.f32.mrf.mxu0 }
  0xe4   :  { %v765_v22 = vpop.f32.mrf.mxu1  ;;  %v789_v25 = vpop.f32.mrf.mxu3  ;;  %v777_v33 = vadd.f32 %v776_v20, %v764_v30  ;;  %v2638_v20 = vld [vmem:[#allocation13] ss:$0 sm:$0xff]  ;;  %1318 = vmatpush.bf16.msrb.mxu0 %v2559_v29  ;;  %v2558_v30 = vld [vmem:[#allocation19 + $0x28] sm:$0xff]  ;;  %v2291_v29 = vld [vmem:[#allocation22 + $0x70] sm:$0xf] }
  0xe5   :  { %1238 = vmatpush.bf16.msra.mxu3 %v2548_v18  ;;  %v2413_v18 = vld [vmem:[#allocation22 + $0x174] sm:$0xf0] }
  0xe6   :  { %v790_v35 = vadd.f32 %v789_v25, %v777_v33  ;;  %v2555_v33 = vld [vmem:[#allocation19 + $0x10] sm:$0xff] }
  0xe8   :  { %1319 = vmatpush.bf16.msrb.mxu0 %v2558_v30  ;;  %v2578_v30 = vld [vmem:[#allocation22 + $0x88] sm:$0xf0] }
  0xe9   :  { %1239 = vmatpush.bf16.msra.mxu3 %v2547_v19 }
  0xeb   :  { %v778_v27 = vpop.f32.mrf.mxu2 }
  0xec   :  { %v791_v31 = vpop.f32.mrf.mxu3  ;;  %v2545_v27 = vld [vmem:[#allocation16] sm:$0xff] }
  0xed   :  { %1240 = vmatpush.bf16.msra.mxu3 %v2546_v26  ;;  %v2557_v31 = vld [vmem:[#allocation19 + $0x20] sm:$0xff] }
  0xee   :  { %1320 = vmatpush.bf16.msrb.mxu0 %v2557_v31  ;;  %v2597_v26 = vld [vmem:[#allocation22 + $0x124] sm:$0xf] }
  0xf1   :  { %1241 = vmatpush.bf16.msra.mxu3 %v2545_v27  ;;  %v2385_v27 = vld [vmem:[#allocation22 + $0x13c] sm:$0xf0] }
  0xf2   :  { %1321 = vmatpush.bf16.msrb.mxu0 %v2556_v32  ;;  %v2388_v31 = vor.u32 %v2597_v26, %v2385_v27 }
  0xf6   :  { %1322 = vmatpush.bf16.msrb.mxu0 %v2555_v33 }
  0xfb   :  { %v802_v36 = vpop.f32.mrf.mxu0 }
  0xfc   :  { %v815_v37 = vpop.f32.mrf.mxu1  ;;  %v803_v39 = vadd.f32 %v802_v36, %v790_v35 }
  0xfe   :  { %v816_v40 = vadd.f32 %v815_v37, %v803_v39 }
 0x103   :  { %v828_v41 = vpop.f32.mrf.mxu2  ;;  %v804_v43 = vpop.f32.mrf.mxu0 }
 0x104   :  { %v829_v42 = vadd.f32 %v828_v41, %v816_v40  ;;  %v817_v44 = vpop.f32.mrf.mxu1  ;;  %v2554_v40 = vld [vmem:[#allocation19 + $0x8] sm:$0xff]  ;;  %v2553_v41 = vld [vmem:[#allocation19] sm:$0xff] }
 0x105   :  { %1323 = vmatpush.bf16.msrb.mxu0 %v2554_v40  ;;  %v2613_v43 = vld [vmem:[#allocation22 + $0x1a0] sm:$0xf0]  ;;  %v2610_v44 = vld [vmem:[#allocation22 + $0x18c] sm:$0xf]  ;;  %v2640_v40 = vld [vmem:[#allocation18] ss:$0 sm:$0xff] }
 0x106   :  { %v832_v45 = vmax.f32 %v829_v42, 0.0  ;;  %v2431_v42 = vld [vmem:[#allocation22 + $0x188] sm:$0xf] }
 0x108   :  { %v833_v46 = vpack.c.bf16 %v832_v45, %v832_v45  ;;  %v2432_v45 = vor.u32 %v2613_v43, %v2431_v42  ;;  %v2263_v42 = vld [vmem:[#allocation22 + $0x38] sm:$0xf]  ;;  %v2571_v43 = vld [vmem:[#allocation22 + $0x50] sm:$0xf0] }
 0x109   :  { %1324 = vmatpush.bf16.msrb.mxu0 %v2553_v41  ;;  %v2292_v41 = vor.u32 %v2578_v30, %v2291_v29  ;;  %v2273_v29 = vld [vmem:[#allocation22 + $0x5c] sm:$0xf0]  ;;  %v2391_v30 = vld [vmem:[#allocation22 + $0x128] sm:$0xf] }
 0x10a   :  { %910 = vmatmul.bf16.vlgmr.msrb.gmra.mxu3 %v833_v46  ;;  %v2433_v46 = vld [vmem:[#allocation22 + $0x1a4] sm:$0xf0]  ;;  %1700 = vmatpush.bf16.msrb.mxu1 %v2432_v45 }
 0x10b   :  { %v830_v47 = vpop.f32.mrf.mxu2  ;;  %v2436_v49 = vor.u32 %v2610_v44, %v2433_v46 }
 0x10c   :  { %v2439_v47 = vld [vmem:[#allocation22 + $0x190] sm:$0xf] }
 0x10d   :  { %v2440_v50 = vor.u32 %v2614_v48, %v2439_v47  ;;  %1713 = vmatpush.bf16.msrb.mxu2 %v2436_v49  ;;  %v2568_v47 = vld [vmem:[#allocation22 + $0x3c] sm:$0xf]  ;;  %v2583_v48 = vld [vmem:[#allocation22 + $0xb4] sm:$0xf]  ;;  %v2329_v49 = vld [vmem:[#allocation22 + $0xcc] sm:$0xf0] }
 0x10e   :  { %1701 = vmatpush.bf16.msrb.mxu1 %v2404_v54  ;;  %v2235_v54 = vld [vmem:[#allocation22] sm:$0xf] }
 0x10f   :  { %1726 = vmatpush.bf16.msrb.mxu3 %v2440_v50  ;;  %v2265_v50 = vld [vmem:[#allocation22 + $0x54] sm:$0xf0] }
 0x18d   :  { %v911_v57 = vpop.f32.mrf.mxu3 }
 0x18e   :  { %v912_v58 = vadd.f32 %v2636_v56, %v911_v57  ;;  %v2411_v56 = vld [vmem:[#allocation22 + $0x158] sm:$0xf]  ;;  %v2607_v57 = vld [vmem:[#allocation22 + $0x170] sm:$0xf0] }
 0x190   :  { %v915_v59 = vmax.f32 %v912_v58, 0.0  ;;  %v2408_v58 = vor.u32 %v2603_v53, %v2405_v55  ;;  %v2264_v53 = vor.u32 %v2571_v43, %v2263_v42  ;;  %v2564_v55 = vld [vmem:[#allocation22 + $0x18] sm:$0xf0]  ;;  %v2363_v42 = vld [vmem:[#allocation22 + $0xf0] sm:$0xf] }
 0x192   :  { %v916_v60 = vpack.c.bf16 %v915_v59, %v915_v59  ;;  %v2412_v59 = vor.u32 %v2607_v57, %v2411_v56  ;;  %1714 = vmatpush.bf16.msrb.mxu2 %v2408_v58  ;;  %v2561_v56 = vld [vmem:[#allocation22 + $0x4] sm:$0xf]  ;;  %v2332_v57 = vor.u32 %v2583_v48, %v2329_v49  ;;  %v2371_v49 = vld [vmem:[#allocation22 + $0xf8] sm:$0xf] }
 0x194   :  { %993 = vmatmul.bf16.vlgmr.msra.gmra.mxu0 %v916_v60  ;;  %v2375_v60 = vld [vmem:[#allocation22 + $0x118] sm:$0xf]  ;;  %1727 = vmatpush.bf16.msrb.mxu3 %v2412_v59  ;;  %v2268_v59 = vor.u32 %v2568_v47, %v2265_v50  ;;  %v2595_v50 = vld [vmem:[#allocation22 + $0x110] sm:$0xf0] }
 0x195   :  { %v913_v61 = vpop.f32.mrf.mxu3 }
 0x196   :  { %v2599_v61 = vld [vmem:[#allocation22 + $0x130] sm:$0xf0]  ;;  %1715 = vmatpush.bf16.msrb.mxu2 %v2380_v5  ;;  %v2455_v5 = vld [vmem:[#allocation22 + $0x1a0] sm:$0xf] }
 0x197   :  { %v2376_v2 = vor.u32 %v2599_v61, %v2375_v60  ;;  %v2272_v60 = vor.u32 %v2572_v52, %v2271_v51  ;;  %v2237_v61 = vld [vmem:[#allocation22 + $0x1c] sm:$0xf0]  ;;  %v2372_v51 = vor.u32 %v2595_v50, %v2371_v49  ;;  %v2335_v52 = vld [vmem:[#allocation22 + $0xb8] sm:$0xf] }
 0x199   :  { %1702 = vmatpush.bf16.msrb.mxu1 %v2376_v2  ;;  %v2615_v2 = vld [vmem:[#allocation22 + $0x1b0] sm:$0xf0] }
 0x19d   :  { %1703 = vmatpush.bf16.msrb.mxu1 %v2348_v15  ;;  %v2452_v15 = vor.u32 %v2612_v3, %v2449_v4  ;;  %v2581_v3 = vld [vmem:[#allocation22 + $0xa0] sm:$0xf0] }
 0x1a1   :  { %1704 = vmatpush.bf16.msrb.mxu1 %v2320_v28  ;;  %v2569_v28 = vld [vmem:[#allocation22 + $0x44] sm:$0xf] }
 0x1a5   :  { %1705 = vmatpush.bf16.msrb.mxu1 %v2292_v41  ;;  %v2245_v41 = vld [vmem:[#allocation22 + $0x24] sm:$0xf0] }
 0x1a9   :  { %1706 = vmatpush.bf16.msrb.mxu1 %v2264_v53  ;;  %v2587_v53 = vld [vmem:[#allocation22 + $0xd0] sm:$0xf0] }
 0x211   :  { %v994_v7 = vpop.f32.mrf.mxu0 }
 0x212   :  { %v995_v8 = vadd.f32 %v2637_v6, %v994_v7  ;;  %v2384_v6 = vor.u32 %v2600_v1, %v2383_v0  ;;  %v2589_v7 = vld [vmem:[#allocation22 + $0xe4] sm:$0xf]  ;;  %v2447_v1 = vld [vmem:[#allocation22 + $0x198] sm:$0xf] }
 0x214   :  { %v998_v9 = vmax.f32 %v995_v8, 0.0  ;;  %v2611_v8 = vld [vmem:[#allocation22 + $0x194] sm:$0xf]  ;;  %1728 = vmatpush.bf16.msrb.mxu3 %v2384_v6  ;;  %v2616_v6 = vld [vmem:[#allocation22 + $0x1b8] sm:$0xf0] }
 0x215   :  { %v2456_v17 = vor.u32 %v2616_v6, %v2455_v5  ;;  %v2279_v6 = vld [vmem:[#allocation22 + $0x48] sm:$0xf] }
 0x216   :  { %v999_v10 = vpack.c.bf16 %v998_v9, %v998_v9  ;;  %v2441_v9 = vld [vmem:[#allocation22 + $0x1ac] sm:$0xf0] }
 0x217   :  { %v2444_v13 = vor.u32 %v2611_v8, %v2441_v9  ;;  %v2236_v8 = vor.u32 %v2564_v55, %v2235_v54  ;;  %v2576_v9 = vld [vmem:[#allocation22 + $0x7c] sm:$0xf]  ;;  %v2336_v55 = vor.u32 %v2587_v53, %v2335_v52 }
 0x218   :  { %1076 = vmatmul.bf16.vlgmr.msra.gmra.mxu1 %v999_v10  ;;  %v2349_v10 = vld [vmem:[#allocation22 + $0xfc] sm:$0xf0]  ;;  %v2584_v54 = vld [vmem:[#allocation22 + $0xbc] sm:$0xf] }
 0x219   :  { %v996_v11 = vpop.f32.mrf.mxu0  ;;  %1739 = vmatpush.bf16.msra.mxu0 %v2444_v13  ;;  %v2352_v19 = vor.u32 %v2589_v7, %v2349_v10  ;;  %v2301_v10 = vld [vmem:[#allocation22 + $0x94] sm:$0xf0]  ;;  %1707 = vmatpush.bf16.msrb.mxu1 %v2236_v8  ;;  %v2570_v8 = vld [vmem:[#allocation22 + $0x4c] sm:$0xf] }
 0x21a   :  { %v2355_v11 = vld [vmem:[#allocation22 + $0xe8] sm:$0xf] }
 0x21b   :  { %1716 = vmatpush.bf16.msrb.mxu2 %v2352_v19  ;;  %v2608_v19 = vld [vmem:[#allocation22 + $0x178] sm:$0xf0] }
 0x295   :  { %v1077_v21 = vpop.f32.mrf.mxu1 }
 0x296   :  { %v1078_v22 = vadd.f32 %v2638_v20, %v1077_v21  ;;  %v2356_v20 = vor.u32 %v2593_v12, %v2355_v11  ;;  %v2582_v21 = vld [vmem:[#allocation22 + $0xac] sm:$0xf]  ;;  %v2240_v11 = vor.u32 %v2561_v56, %v2237_v61  ;;  %v2244_v12 = vor.u32 %v2565_v63, %v2243_v62  ;;  %v2337_v56 = vld [vmem:[#allocation22 + $0xd4] sm:$0xf0]  ;;  %v2307_v61 = vld [vmem:[#allocation22 + $0x80] sm:$0xf] }
 0x297   :  { %v2580_v62 = vld [vmem:[#allocation22 + $0x98] sm:$0xf0]  ;;  %v2577_v63 = vld [vmem:[#allocation22 + $0x84] sm:$0xf] }
 0x298   :  { %v1081_v23 = vmax.f32 %v1078_v22, 0.0  ;;  %v2321_v22 = vld [vmem:[#allocation22 + $0xc4] sm:$0xf0]  ;;  %1729 = vmatpush.bf16.msrb.mxu3 %v2356_v20  ;;  %v2605_v20 = vld [vmem:[#allocation22 + $0x164] sm:$0xf] }
 0x299   :  { %v2324_v32 = vor.u32 %v2582_v21, %v2321_v22  ;;  %v2421_v21 = vld [vmem:[#allocation22 + $0x17c] sm:$0xf0]  ;;  %v2427_v22 = vld [vmem:[#allocation22 + $0x168] sm:$0xf] }
 0x29a   :  { %v1082_v24 = vpack.c.bf16 %v1081_v23, %v1081_v23  ;;  %v2327_v23 = vld [vmem:[#allocation22 + $0xb0] sm:$0xf]  ;;  %v2424_v26 = vor.u32 %v2605_v20, %v2421_v21  ;;  %v2567_v20 = vld [vmem:[#allocation22 + $0x30] sm:$0xf0] }
 0x29b   :  { %1717 = vmatpush.bf16.msrb.mxu2 %v2324_v32  ;;  %v2601_v32 = vld [vmem:[#allocation22 + $0x140] sm:$0xf0] }
 0x29c   :  { %1159 = vmatmul.bf16.vlgmr.msra.gmra.mxu2 %v1082_v24  ;;  %v2416_v24 = vor.u32 %v2604_v14, %v2413_v18  ;;  %v2448_v14 = vor.u32 %v2615_v2, %v2447_v1  ;;  %v2304_v18 = vor.u32 %v2576_v9, %v2301_v10  ;;  %v2309_v1 = vld [vmem:[#allocation22 + $0x9c] sm:$0xf0]  ;;  %v2315_v2 = vld [vmem:[#allocation22 + $0x88] sm:$0xf]  ;;  %v2287_v10 = vld [vmem:[#allocation22 + $0x50] sm:$0xf] }
 0x29d   :  { %v1079_v25 = vpop.f32.mrf.mxu1  ;;  %v2312_v4 = vor.u32 %v2577_v63, %v2309_v1  ;;  %v2316_v5 = vor.u32 %v2581_v3, %v2315_v2  ;;  %v2281_v9 = vld [vmem:[#allocation22 + $0x64] sm:$0xf0] }
 0x29e   :  { %v2586_v25 = vld [vmem:[#allocation22 + $0xc8] sm:$0xf0]  ;;  %1740 = vmatpush.bf16.msra.mxu0 %v2416_v24  ;;  %1752 = vmatpush.bf16.msra.mxu1 %v2448_v14 }
 0x29f   :  { %v2328_v33 = vor.u32 %v2586_v25, %v2327_v23  ;;  %v2609_v23 = vld [vmem:[#allocation22 + $0x180] sm:$0xf0]  ;;  %v2420_v25 = vor.u32 %v2608_v19, %v2419_v16  ;;  %v2566_v16 = vld [vmem:[#allocation22 + $0x28] sm:$0xf0]  ;;  %v2259_v19 = vld [vmem:[#allocation22 + $0x18] sm:$0xf] }
 0x2a0   :  { %v2428_v27 = vor.u32 %v2609_v23, %v2427_v22  ;;  %v2260_v23 = vor.u32 %v2567_v20, %v2259_v19 }
 0x2a1   :  { %1730 = vmatpush.bf16.msrb.mxu3 %v2328_v33  ;;  %v2598_v33 = vld [vmem:[#allocation22 + $0x12c] sm:$0xf] }
 0x2a2   :  { %1741 = vmatpush.bf16.msra.mxu0 %v2388_v31  ;;  %1753 = vmatpush.bf16.msra.mxu1 %v2420_v25  ;;  %v2276_v31 = vor.u32 %v2569_v28, %v2273_v29 }
 0x31f   :  { %v1160_v35 = vpop.f32.mrf.mxu2 }
 0x320   :  { %v1161_v36 = vadd.f32 %v2639_v34, %v1160_v35  ;;  %v2575_v34 = vld [vmem:[#allocation22 + $0x74] sm:$0xf]  ;;  %v2590_v35 = vld [vmem:[#allocation22 + $0xec] sm:$0xf] }
 0x322   :  { %v1164_v37 = vmax.f32 %v1161_v36, 0.0  ;;  %v2357_v36 = vld [vmem:[#allocation22 + $0x104] sm:$0xf0] }
 0x323   :  { %v2360_v44 = vor.u32 %v2590_v35, %v2357_v36  ;;  %v2392_v35 = vor.u32 %v2601_v32, %v2391_v30  ;;  %v1396_v30 = vld [vmem:[%s3238_s16] sm:$0xff] }
 0x324   :  { %v1165_v38 = vpack.c.bf16 %v1164_v37, %v1164_v37  ;;  %v2293_v37 = vld [vmem:[#allocation22 + $0x8c] sm:$0xf0]  ;;  %v1401_v32 = vperm.slane %v1396_v30, 3  ;;  %v1402_v49 = vperm.slane %v1396_v30, 4 }
 0x325   :  { %v2296_v45 = vor.u32 %v2575_v34, %v2293_v37  ;;  %1742 = vmatpush.bf16.msra.mxu0 %v2360_v44  ;;  %v2393_v34 = vld [vmem:[#allocation22 + $0x144] sm:$0xf0]  ;;  %v2399_v37 = vld [vmem:[#allocation22 + $0x130] sm:$0xf]  ;;  %1754 = vmatpush.bf16.msra.mxu1 %v2392_v35  ;;  %v2594_v44 = vld [vmem:[#allocation22 + $0x108] sm:$0xf0] }
 0x326   :  { %1242 = vmatmul.bf16.vlgmr.msra.gmra.mxu3 %v1165_v38  ;;  %v2299_v38 = vld [vmem:[#allocation22 + $0x78] sm:$0xf]  ;;  %v2396_v36 = vor.u32 %v2598_v33, %v2393_v34  ;;  %v2364_v47 = vor.u32 %v2594_v44, %v2363_v42 }
 0x327   :  { %v1162_v39 = vpop.f32.mrf.mxu2  ;;  %1718 = vmatpush.bf16.msrb.mxu2 %v2296_v45  ;;  %v2591_v45 = vld [vmem:[#allocation22 + $0xf4] sm:$0xf] }
 0x328   :  { %v2579_v39 = vld [vmem:[#allocation22 + $0x90] sm:$0xf0] }
 0x329   :  { %v2300_v46 = vor.u32 %v2579_v39, %v2299_v38  ;;  %1743 = vmatpush.bf16.msra.mxu0 %v2332_v57  ;;  %v2602_v38 = vld [vmem:[#allocation22 + $0x148] sm:$0xf0]  ;;  %1755 = vmatpush.bf16.msra.mxu1 %v2364_v47  ;;  %v2343_v57 = vld [vmem:[#allocation22 + $0xc0] sm:$0xf] }
 0x32a   :  { %v2400_v39 = vor.u32 %v2602_v38, %v2399_v37  ;;  %v1399_v38 = vperm.slane %v1396_v30, 1 }
 0x32b   :  { %1731 = vmatpush.bf16.msrb.mxu3 %v2300_v46  ;;  %1719 = vmatpush.bf16.msrb.mxu2 %v2268_v59  ;;  %v2365_v46 = vld [vmem:[#allocation22 + $0x10c] sm:$0xf0]  ;;  %v2340_v59 = vor.u32 %v2584_v54, %v2337_v56  ;;  %v1404_v56 = vperm.slane %v1396_v30, 6 }
 0x32c   :  { %v2368_v48 = vor.u32 %v2591_v45, %v2365_v46 }
 0x32d   :  { %1744 = vmatpush.bf16.msra.mxu0 %v2304_v18  ;;  %1756 = vmatpush.bf16.msra.mxu1 %v2336_v55  ;;  %v2253_v18 = vld [vmem:[#allocation22 + $0x2c] sm:$0xf0]  ;;  %v1403_v55 = vperm.slane %v1396_v30, 5 }
 0x32f   :  { %1732 = vmatpush.bf16.msrb.mxu3 %v2272_v60  ;;  %1720 = vmatpush.bf16.msrb.mxu2 %v2240_v11  ;;  %v2574_v11 = vld [vmem:[#allocation22 + $0x68] sm:$0xf0] }
 0x330   :  { %v2288_v14 = vor.u32 %v2574_v11, %v2287_v10 }
 0x331   :  { %1745 = vmatpush.bf16.msra.mxu0 %v2276_v31  ;;  %v1398_v31 = vperm.slane %v1396_v30, 0 }
 0x333   :  { %1733 = vmatpush.bf16.msrb.mxu3 %v2244_v12  ;;  %1765 = vmatpush.bf16.msra.mxu2 %v2452_v15  ;;  %v2251_v15 = vld [vmem:[#allocation22 + $0x10] sm:$0xf] }
 0x334   :  { %v2252_v21 = vor.u32 %v2566_v16, %v2251_v15 }
 0x337   :  { %1778 = vmatpush.bf16.msra.mxu3 %v2456_v17  ;;  %1766 = vmatpush.bf16.msra.mxu2 %v2424_v26  ;;  %v2563_v17 = vld [vmem:[#allocation22 + $0x14] sm:$0xf] }
 0x338   :  { %v2256_v22 = vor.u32 %v2563_v17, %v2253_v18 }
 0x33b   :  { %1779 = vmatpush.bf16.msra.mxu3 %v2428_v27  ;;  %1767 = vmatpush.bf16.msra.mxu2 %v2396_v36 }
 0x33f   :  { %1780 = vmatpush.bf16.msra.mxu3 %v2400_v39  ;;  %1768 = vmatpush.bf16.msra.mxu2 %v2368_v48 }
 0x343   :  { %1781 = vmatpush.bf16.msra.mxu3 %v2372_v51  ;;  %1769 = vmatpush.bf16.msra.mxu2 %v2340_v59 }
 0x347   :  { %1770 = vmatpush.bf16.msra.mxu2 %v2312_v4 }
 0x3a9   :  { %v1243_v58 = vpop.f32.mrf.mxu3 }
 0x3aa   :  { %v1244_v0 = vadd.f32 %v2640_v40, %v1243_v58  ;;  %v2562_v40 = vld [vmem:[#allocation22 + $0xc] sm:$0xf]  ;;  %v2588_v58 = vld [vmem:[#allocation22 + $0xd8] sm:$0xf0] }
 0x3ab   :  { %v2248_v43 = vor.u32 %v2562_v40, %v2245_v41  ;;  %v2344_v60 = vor.u32 %v2588_v58, %v2343_v57  ;;  %v1400_v40 = vperm.slane %v1396_v30, 2 }
 0x3ac   :  { %v1247_v7 = vmax.f32 %v1244_v0, 0.0  ;;  %v2308_v0 = vor.u32 %v2580_v62, %v2307_v61 }
 0x3ad   :  { %1746 = vmatpush.bf16.msra.mxu0 %v2248_v43  ;;  %1782 = vmatpush.bf16.msra.mxu3 %v2344_v60 }
 0x3ae   :  { %v1248_v13 = vpack.c.bf16 %v1247_v7, %v1247_v7  ;;  %v2573_v7 = vld [vmem:[#allocation22 + $0x60] sm:$0xf0]  ;;  %1757 = vmatpush.bf16.msra.mxu1 %v2308_v0 }
 0x3af   :  { %v2280_v12 = vor.u32 %v2573_v7, %v2279_v6 }
 0x3b0   :  { %1325 = vmatmul.bf16.vlgmr.msrb.gmra.mxu0 %v1248_v13  ;;  %v2284_v13 = vor.u32 %v2570_v8, %v2281_v9 }
 0x3b1   :  { %v1245_v24 = vpop.f32.mrf.mxu3  ;;  %1783 = vmatpush.bf16.msra.mxu3 %v2316_v5 }
 0x3b2   :  { %1758 = vmatpush.bf16.msra.mxu1 %v2280_v12  ;;  %1771 = vmatpush.bf16.msra.mxu2 %v2284_v13  ;;  %v2641_v24 = vld [vmem:[#allocation21] ss:$0 sm:$0xff] }
 0x3b5   :  { %1784 = vmatpush.bf16.msra.mxu3 %v2288_v14 }
 0x3b6   :  { %1759 = vmatpush.bf16.msra.mxu1 %v2252_v21  ;;  %1772 = vmatpush.bf16.msra.mxu2 %v2256_v22 }
 0x3b9   :  { %1785 = vmatpush.bf16.msra.mxu3 %v2260_v23 }
 0x42d   :  { %v1326_v25 = vpop.f32.mrf.mxu0 }
 0x42e   :  { %v1327_v26 = vadd.f32 %v2641_v24, %v1326_v25 }
 0x430   :  { %v1330_v27 = vmax.f32 %v1327_v26, 0.0 }
 0x432   :  { %v1331_v28 = vpack.c.bf16 %v1330_v27, %v1330_v27 }
 0x434   :  { %1708 = vmatmul.bf16.vlgmr.msrb.gmra.mxu1 %v1331_v28  ;;  %1721 = vmatmul.bf16.vlgmr.msrb.gmra.mxu2 %v1331_v28 }
 0x435   :  { %1734 = vmatmul.bf16.vlgmr.msrb.gmra.mxu3 %v1331_v28  ;;  %1747 = vmatmul.bf16.vlgmr.msra.gmra.mxu0 %v1331_v28  ;;  %v1328_v29 = vpop.f32.mrf.mxu0 }
 0x444   :  { %1760 = vmatmul.bf16.vlgmr.msra.gmra.mxu1 %v1331_v28  ;;  %1773 = vmatmul.bf16.vlgmr.msra.gmra.mxu2 %v1331_v28 }
 0x445   :  { %1786 = vmatmul.bf16.vlgmr.msra.gmra.mxu3 %v1331_v28 }
 0x4b1   :  { %v1709_v33 = vpop.f32.mrf.mxu1 }
 0x4b2   :  { %v1710_v34 = vadd.f32 %v1709_v33, %v1398_v31  ;;  %v1748_v35 = vpop.f32.mrf.mxu0 }
 0x4b3   :  { %v1749_v36 = vadd.f32 %v1748_v35, %v1401_v32 }
 0x4b4   :  { %v1791_v37 = vmax.f32 %v1710_v34, 0.0 }
 0x4b5   :  { %v1794_v39 = vmax.f32 %v1749_v36, 0.0 }
 0x4b6   :  { %1798 = vst [vmem:[%s3239_s17] sm:$0xff] %v1791_v37 }
 0x4b7   :  { %1801 = vst [vmem:[%s3239_s17 + $0x18] sm:$0xff] %v1794_v39  ;;  %v1722_v41 = vpop.f32.mrf.mxu2 }
 0x4b8   :  { %v1723_v42 = vadd.f32 %v1722_v41, %v1399_v38  ;;  %v1735_v43 = vpop.f32.mrf.mxu3 }
 0x4b9   :  { %v1736_v44 = vadd.f32 %v1735_v43, %v1400_v40  ;;  %v1711_v45 = vpop.f32.mrf.mxu1 }
 0x4ba   :  { %v1792_v46 = vmax.f32 %v1723_v42, 0.0  ;;  %v1750_v47 = vpop.f32.mrf.mxu0 }
 0x4bb   :  { %v1793_v48 = vmax.f32 %v1736_v44, 0.0 }
 0x4bc   :  { %1799 = vst [vmem:[%s3239_s17 + $0x8] sm:$0xff] %v1792_v46 }
 0x4bd   :  { %1800 = vst [vmem:[%s3239_s17 + $0x10] sm:$0xff] %v1793_v48 }
 0x4bf   :  { %v1724_v50 = vpop.f32.mrf.mxu2 }
 0x4c0   :  { %v1737_v51 = vpop.f32.mrf.mxu3 }
 0x4c1   :  { %v1761_v52 = vpop.f32.mrf.mxu1 }
 0x4c2   :  { %v1762_v53 = vadd.f32 %v1761_v52, %v1402_v49 }
 0x4c4   :  { %v1795_v54 = vmax.f32 %v1762_v53, 0.0 }
 0x4c6   :  { %1802 = vst [vmem:[%s3239_s17 + $0x20] sm:$0xff] %v1795_v54 }
 0x4c7   :  { %v1774_v57 = vpop.f32.mrf.mxu2 }
 0x4c8   :  { %v1775_v58 = vadd.f32 %v1774_v57, %v1403_v55  ;;  %v1787_v59 = vpop.f32.mrf.mxu3 }
 0x4c9   :  { %v1788_v60 = vadd.f32 %v1787_v59, %v1404_v56  ;;  %v1763_v61 = vpop.f32.mrf.mxu1 }
 0x4ca   :  { %v1796_v62 = vmax.f32 %v1775_v58, 0.0 }
 0x4cb   :  { %v1797_v63 = vmax.f32 %v1788_v60, 0.0 }
 0x4cc   :  { %1803 = vst [vmem:[%s3239_s17 + $0x28] sm:$0xff] %v1796_v62 }
 0x4cd   :  { %1804 = vst [vmem:[%s3239_s17 + $0x30] sm:$0xff] %v1797_v63 }
 0x4cf   :  { %v1776_v0 = vpop.f32.mrf.mxu2 }
 0x4d0   :  { %v1789_v1 = vpop.f32.mrf.mxu3 }
 0x4d1   :  { %1809 = vsyncpa [#allocation3], 1 }
 0x4d2   :  { %1810 = vsyncpa [#allocation5], 1 }
 0x4d3   :  { %1811 = vsyncpa [#allocation8], 1 }
 0x4d4   :  { %1812 = vsyncpa [#allocation11], 1 }
 0x4d5   :  { %1813 = vsyncpa [#allocation14], 1 }
 0x4d6   :  { %1814 = vsyncpa [#allocation17], 1 }
 0x4d7   :  { %1815 = vsyncpa [#allocation20], 1 }
 0x4d8   :  { %1816 = vsyncpa [#allocation23], 1 }

</bundles_post_ra>
